<compile_context>
chip_gen: v7x
topology: tpu7x:2x2x1
jax: 0.10.0
libtpu: 0.0.40
codegen_flags: <defaults>
</compile_context>

<pallas_src>
import functools
import math

import jax
import jax.numpy as jnp
from jax import lax
from jax.experimental import pallas as pl
from jax.experimental.pallas import tpu as pltpu

_INV_SQRT2 = 0.7071067811865476


# ----------------------------------------------------------------------------------
# Fused kernel: grid = (phase, M-tile).  phase 0: matmul + stats, phase 1: BN + GELU.
# ----------------------------------------------------------------------------------
def _fused_conv_bn_gelu_kernel(xT_ref, wT_ref, g_ref, b_ref, oT_ref,
                               y_vmem, s1_ref, s2_ref, c_ref, sc_ref, sh_ref,
                               *, tile_m, m_valid, needs_mask, eps):
    p = pl.program_id(0)       # 0: conv matmul + statistics, 1: BN affine + GELU
    i = pl.program_id(1)       # tile index along the flattened M = N*OH*OW axis

    # ---------------- phase 0: conv-as-matmul + BN statistics ----------------
    @pl.when(p == 0)
    def _phase0():
        # MXU: [C_out, K] @ [K, tile_m] -> [C_out, tile_m], f32 accumulation.
        y = jnp.dot(wT_ref[...], xT_ref[...], preferred_element_type=jnp.float32)
        y_vmem[i] = y                      # keep the conv output on-chip for phase 1

        @pl.when(i == 0)
        def _init():
            s1_ref[...] = jnp.zeros_like(s1_ref)
            s2_ref[...] = jnp.zeros_like(s2_ref)
            # Centering constant (~ batch mean, from the first tile) for a numerically
            # stable shifted-data variance (avoids E[y^2] - E[y]^2 cancellation).
            c_ref[...] = jnp.sum(y, axis=1, keepdims=True) * (1.0 / tile_m)

        d = y - c_ref[...]
        if needs_mask:
            # Zero-padded tail columns of the last tile must not pollute the stats.
            col = lax.broadcasted_iota(jnp.int32, (1, tile_m), 1) + i * tile_m
            d = jnp.where(col < m_valid, d, 0.0)
        s1_ref[...] += jnp.sum(d, axis=1, keepdims=True)
        s2_ref[...] += jnp.sum(d * d, axis=1, keepdims=True)

    # -------- phase transition: finalize mean / biased var -> scale / shift --------
    @pl.when(jnp.logical_and(p == 1, i == 0))
    def _finalize():
        inv_m = 1.0 / m_valid
        dmean = s1_ref[...] * inv_m
        mean = c_ref[...] + dmean
        var = jnp.maximum(s2_ref[...] * inv_m - dmean * dmean, 0.0)   # biased (training BN)
        scale = g_ref[...] * lax.rsqrt(var + eps)
        sc_ref[...] = scale
        sh_ref[...] = b_ref[...] - mean * scale

    # ---------------- phase 1: BN affine + exact (erf) GELU ----------------
    @pl.when(p == 1)
    def _phase1():
        z = y_vmem[i] * sc_ref[...] + sh_ref[...]
        oT_ref[...] = 0.5 * z * (1.0 + lax.erf(z * _INV_SQRT2))


# ----------------------------------------------------------------------------------
# Fallback kernels (two lane-dense passes) for conv outputs too large for VMEM.
# ----------------------------------------------------------------------------------
def _convT_kernel(xT_ref, wT_ref, yT_ref):
    yT_ref[...] = jnp.dot(wT_ref[...], xT_ref[...], preferred_element_type=jnp.float32)


def _bn_gelu_kernel(yT_ref, sc_ref, sh_ref, oT_ref):
    z = yT_ref[...] * sc_ref[...] + sh_ref[...]
    oT_ref[...] = 0.5 * z * (1.0 + lax.erf(z * _INV_SQRT2))


# ----------------------------------------------------------------------------------
# Wrapper
# ----------------------------------------------------------------------------------
def conv_bn_gelu(x_nchw, weight, gamma, beta, *, stride=(1, 1), pad=(0, 0),
                 dilation=1, groups=1, eps=1e-5, tile_m=1024):
    """Forward pass of Conv_BN_GeLU (BatchNorm2d in training mode: batch statistics)."""
    assert groups == 1, "groups > 1 not supported"  # TODO(synk): grouped conv
    N, C_in, H, W = x_nchw.shape
    C_out, C_in_w, KH, KW = weight.shape
    assert C_in_w == C_in
    sH, sW = (stride, stride) if isinstance(stride, int) else stride
    pH, pW = (pad, pad) if isinstance(pad, int) else pad
    dH, dW = (dilation, dilation) if isinstance(dilation, int) else dilation

    OH = (H + 2 * pH - dH * (KH - 1) - 1) // sH + 1
    OW = (W + 2 * pW - dW * (KW - 1) - 1) // sW + 1
    M = N * OH * OW
    K = C_in * KH * KW

    # ---- tile / grid geometry: no divisibility requirement on M ----
    tile_m = min(tile_m, -(-M // 128) * 128)
    tile_m = max(128, (tile_m // 128) * 128)
    grid_m = -(-M // tile_m)
    m_pad = grid_m * tile_m

    # ---- build the patch matrix directly in transposed [K, M] layout (bf16) ----
    # K-order = (kh, kw, c_in); M-order = (n, oh, ow).  Casting the input to bf16 first
    # halves the bytes of the expanded patch stream; the MXU accumulates in f32.
    # TODO(synk): the patch tensor still replicates the input KH*KW times in HBM; fully
    # removing that read amplification needs in-kernel halo-block patch extraction.
    xp = jnp.transpose(x_nchw, (1, 0, 2, 3)).astype(jnp.bfloat16)        # [C, N, H, W]
    xp = jnp.pad(xp, ((0, 0), (0, 0), (pH, pH), (pW, pW)))
    slices = []
    for kh in range(KH):
        for kw in range(KW):
            h0, w0 = kh * dH, kw * dW
            slices.append(xp[:, :, h0:h0 + (OH - 1) * sH + 1:sH,
                                    w0:w0 + (OW - 1) * sW + 1:sW])        # [C, N, OH, OW]
    xT = jnp.stack(slices, axis=0).reshape(K, M)                          # [K, M]
    if m_pad != M:
        xT = jnp.pad(xT, ((0, 0), (0, m_pad - M)))

    # weight reordered to the (kh, kw, c_in) K-order (tiny tensor -> essentially free)
    wT = jnp.transpose(weight, (0, 2, 3, 1)).reshape(C_out, K).astype(jnp.bfloat16)
    g2 = gamma.reshape(C_out, 1).astype(jnp.float32)
    b2 = beta.reshape(C_out, 1).astype(jnp.float32)

    # ---- VMEM budget: fuse into a single kernel iff the f32 conv output fits on-chip ----
    y_bytes = grid_m * C_out * tile_m * 4
    pipe_bytes = 2 * (K * tile_m * 2 + C_out * tile_m * 4) + C_out * K * 2 + (1 << 20)
    use_fused = (y_bytes + pipe_bytes) <= 40 * 1024 * 1024    # headroom below v7x's 64 MiB

    if use_fused:
        vmem_limit = int(min(56 << 20, max(32 << 20, 2 * (y_bytes + pipe_bytes))))
        kern = functools.partial(_fused_conv_bn_gelu_kernel,
                                 tile_m=tile_m, m_valid=M,
                                 needs_mask=(m_pad != M), eps=eps)
        oT = pl.pallas_call(
            kern,
            out_shape=jax.ShapeDtypeStruct((C_out, m_pad), jnp.float32),
            grid_spec=pltpu.PrefetchScalarGridSpec(
                num_scalar_prefetch=0,
                grid=(2, grid_m),                                   # (phase, M-tile)
                in_specs=[
                    # patch tiles only needed in phase 0; constant index in phase 1
                    pl.BlockSpec((K, tile_m), lambda p, i: (0, i * (1 - p))),
                    pl.BlockSpec((C_out, K), lambda p, i: (0, 0)),  # resident weight
                    pl.BlockSpec((C_out, 1), lambda p, i: (0, 0)),  # gamma
                    pl.BlockSpec((C_out, 1), lambda p, i: (0, 0)),  # beta
                ],
                # output only written in phase 1 (lane-dense [C_out, tile_m] tiles)
                out_specs=pl.BlockSpec((C_out, tile_m), lambda p, i: (0, i * p)),
                scratch_shapes=[
                    pltpu.VMEM((grid_m, C_out, tile_m), jnp.float32),  # resident conv output
                    pltpu.VMEM((C_out, 1), jnp.float32),               # centered sum
                    pltpu.VMEM((C_out, 1), jnp.float32),               # centered sum of squares
                    pltpu.VMEM((C_out, 1), jnp.float32),               # centering constant
                    pltpu.VMEM((C_out, 1), jnp.float32),               # BN scale
                    pltpu.VMEM((C_out, 1), jnp.float32),               # BN shift
                ]),
            compiler_params=pltpu.CompilerParams(
                # both grid axes carry state in VMEM scratch -> sequential
                dimension_semantics=("arbitrary", "arbitrary"),
                vmem_limit_bytes=vmem_limit),
        )(xT, wT, g2, b2)
    else:
        # ---- fallback: two lane-dense passes (conv output too big for VMEM) ----
        vmem_limit = int(min(56 << 20, max(32 << 20, 2 * pipe_bytes)))
        yT = pl.pallas_call(
            _convT_kernel,
            out_shape=jax.ShapeDtypeStruct((C_out, m_pad), jnp.float32),
            grid_spec=pltpu.PrefetchScalarGridSpec(
                num_scalar_prefetch=0, grid=(grid_m,),
                in_specs=[pl.BlockSpec((K, tile_m), lambda i: (0, i)),
                          pl.BlockSpec((C_out, K), lambda i: (0, 0))],
                out_specs=pl.BlockSpec((C_out, tile_m), lambda i: (0, i))),
            compiler_params=pltpu.CompilerParams(
                dimension_semantics=("parallel",),        # lets v7x use both TensorCores
                vmem_limit_bytes=vmem_limit),
        )(xT, wT)
        yv = yT[:, :M]
        mean = jnp.mean(yv, axis=1, keepdims=True)
        var = jnp.mean(jnp.square(yv - mean), axis=1, keepdims=True)   # biased, centered
        scale = g2 * lax.rsqrt(var + eps)
        shift = b2 - mean * scale
        oT = pl.pallas_call(
            _bn_gelu_kernel,
            out_shape=jax.ShapeDtypeStruct((C_out, m_pad), jnp.float32),
            grid_spec=pltpu.PrefetchScalarGridSpec(
                num_scalar_prefetch=0, grid=(grid_m,),
                in_specs=[pl.BlockSpec((C_out, tile_m), lambda i: (0, i)),
                          pl.BlockSpec((C_out, 1), lambda i: (0, 0)),
                          pl.BlockSpec((C_out, 1), lambda i: (0, 0))],
                out_specs=pl.BlockSpec((C_out, tile_m), lambda i: (0, i))),
            input_output_aliases={0: 0},        # write the activation over the conv output
            compiler_params=pltpu.CompilerParams(
                dimension_semantics=("parallel",),
                vmem_limit_bytes=vmem_limit),
        )(yT, scale, shift)

    # ---- glue: [C_out, M] -> NCHW ----
    return oT[:, :M].reshape(C_out, N, OH, OW).transpose(1, 0, 2, 3)


if __name__ == "__main__":
    # Matches Conv_BN_GeLU(in_chan=4, out_chan=8, k_size=(3,3), strd=(1,1),
    #                      pad=(1,1), groups=1, dilation=1)
    N, C_in, H, W = 2, 4, 16, 16
    C_out, KH, KW = 8, 3, 3

    key = jax.random.PRNGKey(0)
    k_x, k_w, k_g, k_b = jax.random.split(key, 4)

    x = jax.random.normal(k_x, (N, C_in, H, W), dtype=jnp.float32)
    fan_in = C_in * KH * KW
    weight = jax.random.uniform(k_w, (C_out, C_in, KH, KW), dtype=jnp.float32,
                                minval=-1.0, maxval=1.0) / math.sqrt(fan_in)
    # BatchNorm2d affine params (PyTorch inits gamma=1, beta=0; perturbed here to
    # exercise the affine path deterministically).
    gamma = 1.0 + 0.1 * jax.random.normal(k_g, (C_out,), dtype=jnp.float32)
    beta = 0.1 * jax.random.normal(k_b, (C_out,), dtype=jnp.float32)

    fwd = jax.jit(functools.partial(conv_bn_gelu, stride=(1, 1), pad=(1, 1),
                                    dilation=1, groups=1))
    out = jax.block_until_ready(fwd(x, weight, gamma, beta))
    assert out.shape == (N, C_out, H, W), out.shape
    assert out.dtype == jnp.float32

    # Quick correctness sanity check against a pure-JAX f32 reference
    # (loose tolerance: the kernel uses bf16 MXU operands).
    def ref_fwd(x, w, g, b, eps=1e-5):
        y = lax.conv_general_dilated(x, w, window_strides=(1, 1),
                                     padding=((1, 1), (1, 1)),
                                     dimension_numbers=("NCHW", "OIHW", "NCHW"))
        mu = jnp.mean(y, axis=(0, 2, 3), keepdims=True)
        var = jnp.mean(jnp.square(y - mu), axis=(0, 2, 3), keepdims=True)
        z = (y - mu) * lax.rsqrt(var + eps) * g.reshape(1, -1, 1, 1) + b.reshape(1, -1, 1, 1)
        return 0.5 * z * (1.0 + lax.erf(z * _INV_SQRT2))

    ref = ref_fwd(x, weight, gamma, beta)
    max_err = float(jnp.max(jnp.abs(out - ref)))
    assert max_err < 1e-1, f"max abs err vs reference: {max_err}"
    print("KERNEL_OK")
</pallas_src>

<mosaic_0001>
module attributes {stable_mosaic.version = 11 : i64} {
  func.func @_fused_conv_bn_gelu_kernel(%arg0: i32, %arg1: i32, %arg2: memref<36x512xbf16, #tpu.memory_space<vmem>>, %arg3: memref<8x36xbf16, #tpu.memory_space<vmem>>, %arg4: memref<8x1xf32, #tpu.memory_space<vmem>>, %arg5: memref<8x1xf32, #tpu.memory_space<vmem>>, %arg6: memref<8x512xf32, #tpu.memory_space<vmem>>, %arg7: memref<1x8x512xf32, #tpu.memory_space<vmem>>, %arg8: memref<8x1xf32, #tpu.memory_space<vmem>>, %arg9: memref<8x1xf32, #tpu.memory_space<vmem>>, %arg10: memref<8x1xf32, #tpu.memory_space<vmem>>, %arg11: memref<8x1xf32, #tpu.memory_space<vmem>>, %arg12: memref<8x1xf32, #tpu.memory_space<vmem>>) attributes {dimension_semantics = [#tpu.dimension_semantics<arbitrary>, #tpu.dimension_semantics<arbitrary>], iteration_bounds = array<i64: 2, 1>, scalar_prefetch = 0 : i64, scratch_operands = 6 : i64, tpu.core_type = #tpu.core_type<tc>, window_params = [{transform_indices = @transform_0, window_bounds = array<i64: 36, 512>}, {pipeline_mode = #tpu.pipeline_mode<synchronous>, transform_indices = @transform_1, window_bounds = array<i64: 8, 36>}, {pipeline_mode = #tpu.pipeline_mode<synchronous>, transform_indices = @transform_2, window_bounds = array<i64: 8, 1>}, {pipeline_mode = #tpu.pipeline_mode<synchronous>, transform_indices = @transform_3, window_bounds = array<i64: 8, 1>}, {transform_indices = @transform_4, window_bounds = array<i64: 8, 512>}]} {
    %c0_i32 = arith.constant 0 : i32
    %0 = arith.cmpi eq, %arg0, %c0_i32 : i32
    %1 = arith.extui %0 : i1 to i32
    %c0_i32_0 = arith.constant 0 : i32
    %2 = arith.cmpi ne, %1, %c0_i32_0 : i32
    scf.if %2 {
      %c0 = arith.constant 0 : index
      %c0_5 = arith.constant 0 : index
      %11 = vector.load %arg3[%c0, %c0_5] : memref<8x36xbf16, #tpu.memory_space<vmem>>, vector<8x36xbf16>
      %c0_6 = arith.constant 0 : index
      %c0_7 = arith.constant 0 : index
      %12 = vector.load %arg2[%c0_6, %c0_7] : memref<36x512xbf16, #tpu.memory_space<vmem>>, vector<36x512xbf16>
      %cst = arith.constant dense<0.000000e+00> : vector<8x512xf32>
      %13 = tpu.matmul %11, %12, %cst {dimension_numbers = #tpu.dot_dimension_numbers<[1], [0], [0], [1], [0, 0, 1, 1], [], []>} : vector<8x36xbf16>, vector<36x512xbf16>, vector<8x512xf32> -> vector<8x512xf32>
      %14 = arith.index_cast %arg1 : i32 to index
      %c0_8 = arith.constant 0 : index
      %c0_9 = arith.constant 0 : index
      %15 = vector.load %arg7[%14, %c0_8, %c0_9] : memref<1x8x512xf32, #tpu.memory_space<vmem>>, vector<1x8x512xf32>
      %16 = vector.shape_cast %15 : vector<1x8x512xf32> to vector<8x512xf32>
      %17 = vector.shape_cast %13 : vector<8x512xf32> to vector<1x8x512xf32>
      tpu.vector_store %arg7[%14, %c0_8, %c0_9], %17 {strides = array<i32>} : memref<1x8x512xf32, #tpu.memory_space<vmem>>, vector<1x8x512xf32>,
      %c0_i32_10 = arith.constant 0 : i32
      %18 = arith.cmpi eq, %arg1, %c0_i32_10 : i32
      %19 = arith.extui %18 : i1 to i32
      %c0_i32_11 = arith.constant 0 : i32
      %20 = arith.cmpi ne, %19, %c0_i32_11 : i32
      scf.if %20 {
        %cst_24 = arith.constant 0.000000e+00 : f32
        %35 = vector.broadcast %cst_24 : f32 to vector<8x1xf32>
        %c0_25 = arith.constant 0 : index
        %c0_26 = arith.constant 0 : index
        %36 = vector.load %arg8[%c0_25, %c0_26] : memref<8x1xf32, #tpu.memory_space<vmem>>, vector<8x1xf32>
        tpu.vector_store %arg8[%c0_25, %c0_26], %35 {strides = array<i32>} : memref<8x1xf32, #tpu.memory_space<vmem>>, vector<8x1xf32>,
        %cst_27 = arith.constant 0.000000e+00 : f32
        %37 = vector.broadcast %cst_27 : f32 to vector<8x1xf32>
        %c0_28 = arith.constant 0 : index
        %c0_29 = arith.constant 0 : index
        %38 = vector.load %arg9[%c0_28, %c0_29] : memref<8x1xf32, #tpu.memory_space<vmem>>, vector<8x1xf32>
        tpu.vector_store %arg9[%c0_28, %c0_29], %37 {strides = array<i32>} : memref<8x1xf32, #tpu.memory_space<vmem>>, vector<8x1xf32>,
        %cst_30 = arith.constant dense<0.000000e+00> : vector<8xf32>
        %39 = vector.multi_reduction <add>, %13, %cst_30 [1] : vector<8x512xf32> to vector<8xf32>
        %40 = vector.shape_cast %39 : vector<8xf32> to vector<8x1xf32>
        %cst_31 = arith.constant 0.001953125 : f32
        %41 = vector.broadcast %cst_31 : f32 to vector<8x1xf32>
        %42 = arith.mulf %40, %41 : vector<8x1xf32>
        %c0_32 = arith.constant 0 : index
        %c0_33 = arith.constant 0 : index
        %43 = vector.load %arg10[%c0_32, %c0_33] : memref<8x1xf32, #tpu.memory_space<vmem>>, vector<8x1xf32>
        tpu.vector_store %arg10[%c0_32, %c0_33], %42 {strides = array<i32>} : memref<8x1xf32, #tpu.memory_space<vmem>>, vector<8x1xf32>,
      } else {
      }
      %c0_12 = arith.constant 0 : index
      %c0_13 = arith.constant 0 : index
      %21 = vector.load %arg10[%c0_12, %c0_13] : memref<8x1xf32, #tpu.memory_space<vmem>>, vector<8x1xf32>
      %22 = vector.broadcast %21 : vector<8x1xf32> to vector<8x512xf32>
      %23 = arith.subf %13, %22 : vector<8x512xf32>
      %c0_14 = arith.constant 0 : index
      %c0_15 = arith.constant 0 : index
      %24 = vector.load %arg8[%c0_14, %c0_15] : memref<8x1xf32, #tpu.memory_space<vmem>>, vector<8x1xf32>
      %cst_16 = arith.constant dense<0.000000e+00> : vector<8xf32>
      %25 = vector.multi_reduction <add>, %23, %cst_16 [1] : vector<8x512xf32> to vector<8xf32>
      %26 = vector.shape_cast %25 : vector<8xf32> to vector<8x1xf32>
      %27 = arith.addf %24, %26 : vector<8x1xf32>
      %c0_17 = arith.constant 0 : index
      %c0_18 = arith.constant 0 : index
      %28 = vector.load %arg8[%c0_17, %c0_18] : memref<8x1xf32, #tpu.memory_space<vmem>>, vector<8x1xf32>
      tpu.vector_store %arg8[%c0_17, %c0_18], %27 {strides = array<i32>} : memref<8x1xf32, #tpu.memory_space<vmem>>, vector<8x1xf32>,
      %c0_19 = arith.constant 0 : index
      %c0_20 = arith.constant 0 : index
      %29 = vector.load %arg9[%c0_19, %c0_20] : memref<8x1xf32, #tpu.memory_space<vmem>>, vector<8x1xf32>
      %30 = arith.mulf %23, %23 : vector<8x512xf32>
      %cst_21 = arith.constant dense<0.000000e+00> : vector<8xf32>
      %31 = vector.multi_reduction <add>, %30, %cst_21 [1] : vector<8x512xf32> to vector<8xf32>
      %32 = vector.shape_cast %31 : vector<8xf32> to vector<8x1xf32>
      %33 = arith.addf %29, %32 : vector<8x1xf32>
      %c0_22 = arith.constant 0 : index
      %c0_23 = arith.constant 0 : index
      %34 = vector.load %arg9[%c0_22, %c0_23] : memref<8x1xf32, #tpu.memory_space<vmem>>, vector<8x1xf32>
      tpu.vector_store %arg9[%c0_22, %c0_23], %33 {strides = array<i32>} : memref<8x1xf32, #tpu.memory_space<vmem>>, vector<8x1xf32>,
    } else {
    }
    %c1_i32 = arith.constant 1 : i32
    %3 = arith.cmpi eq, %arg0, %c1_i32 : i32
    %c0_i32_1 = arith.constant 0 : i32
    %4 = arith.cmpi eq, %arg1, %c0_i32_1 : i32
    %5 = arith.andi %3, %4 : i1
    %6 = arith.extui %5 : i1 to i32
    %c0_i32_2 = arith.constant 0 : i32
    %7 = arith.cmpi ne, %6, %c0_i32_2 : i32
    scf.if %7 {
      %c0 = arith.constant 0 : index
      %c0_5 = arith.constant 0 : index
      %11 = vector.load %arg8[%c0, %c0_5] : memref<8x1xf32, #tpu.memory_space<vmem>>, vector<8x1xf32>
      %cst = arith.constant 0.001953125 : f32
      %12 = vector.broadcast %cst : f32 to vector<8x1xf32>
      %13 = arith.mulf %11, %12 : vector<8x1xf32>
      %c0_6 = arith.constant 0 : index
      %c0_7 = arith.constant 0 : index
      %14 = vector.load %arg10[%c0_6, %c0_7] : memref<8x1xf32, #tpu.memory_space<vmem>>, vector<8x1xf32>
      %15 = arith.addf %14, %13 : vector<8x1xf32>
      %c0_8 = arith.constant 0 : index
      %c0_9 = arith.constant 0 : index
      %16 = vector.load %arg9[%c0_8, %c0_9] : memref<8x1xf32, #tpu.memory_space<vmem>>, vector<8x1xf32>
      %cst_10 = arith.constant 0.001953125 : f32
      %17 = vector.broadcast %cst_10 : f32 to vector<8x1xf32>
      %18 = arith.mulf %16, %17 : vector<8x1xf32>
      %19 = arith.mulf %13, %13 : vector<8x1xf32>
      %20 = arith.subf %18, %19 : vector<8x1xf32>
      %cst_11 = arith.constant 0.000000e+00 : f32
      %21 = vector.broadcast %cst_11 : f32 to vector<8x1xf32>
      %22 = arith.maximumf %20, %21 : vector<8x1xf32>
      %c0_12 = arith.constant 0 : index
      %c0_13 = arith.constant 0 : index
      %23 = vector.load %arg4[%c0_12, %c0_13] : memref<8x1xf32, #tpu.memory_space<vmem>>, vector<8x1xf32>
      %cst_14 = arith.constant 9.99999974E-6 : f32
      %24 = vector.broadcast %cst_14 : f32 to vector<8x1xf32>
      %25 = arith.addf %22, %24 : vector<8x1xf32>
      %26 = math.rsqrt %25 : vector<8x1xf32>
      %27 = arith.mulf %23, %26 : vector<8x1xf32>
      %c0_15 = arith.constant 0 : index
      %c0_16 = arith.constant 0 : index
      %28 = vector.load %arg11[%c0_15, %c0_16] : memref<8x1xf32, #tpu.memory_space<vmem>>, vector<8x1xf32>
      tpu.vector_store %arg11[%c0_15, %c0_16], %27 {strides = array<i32>} : memref<8x1xf32, #tpu.memory_space<vmem>>, vector<8x1xf32>,
      %c0_17 = arith.constant 0 : index
      %c0_18 = arith.constant 0 : index
      %29 = vector.load %arg5[%c0_17, %c0_18] : memref<8x1xf32, #tpu.memory_space<vmem>>, vector<8x1xf32>
      %30 = arith.mulf %15, %27 : vector<8x1xf32>
      %31 = arith.subf %29, %30 : vector<8x1xf32>
      %c0_19 = arith.constant 0 : index
      %c0_20 = arith.constant 0 : index
      %32 = vector.load %arg12[%c0_19, %c0_20] : memref<8x1xf32, #tpu.memory_space<vmem>>, vector<8x1xf32>
      tpu.vector_store %arg12[%c0_19, %c0_20], %31 {strides = array<i32>} : memref<8x1xf32, #tpu.memory_space<vmem>>, vector<8x1xf32>,
    } else {
    }
    %c1_i32_3 = arith.constant 1 : i32
    %8 = arith.cmpi eq, %arg0, %c1_i32_3 : i32
    %9 = arith.extui %8 : i1 to i32
    %c0_i32_4 = arith.constant 0 : i32
    %10 = arith.cmpi ne, %9, %c0_i32_4 : i32
    scf.if %10 {
      %11 = arith.index_cast %arg1 : i32 to index
      %c0 = arith.constant 0 : index
      %c0_5 = arith.constant 0 : index
      %12 = vector.load %arg7[%11, %c0, %c0_5] : memref<1x8x512xf32, #tpu.memory_space<vmem>>, vector<1x8x512xf32>
      %13 = vector.shape_cast %12 : vector<1x8x512xf32> to vector<8x512xf32>
      %c0_6 = arith.constant 0 : index
      %c0_7 = arith.constant 0 : index
      %14 = vector.load %arg11[%c0_6, %c0_7] : memref<8x1xf32, #tpu.memory_space<vmem>>, vector<8x1xf32>
      %15 = vector.broadcast %14 : vector<8x1xf32> to vector<8x512xf32>
      %16 = arith.mulf %13, %15 : vector<8x512xf32>
      %c0_8 = arith.constant 0 : index
      %c0_9 = arith.constant 0 : index
      %17 = vector.load %arg12[%c0_8, %c0_9] : memref<8x1xf32, #tpu.memory_space<vmem>>, vector<8x1xf32>
      %18 = vector.broadcast %17 : vector<8x1xf32> to vector<8x512xf32>
      %19 = arith.addf %16, %18 : vector<8x512xf32>
      %cst = arith.constant 5.000000e-01 : f32
      %20 = vector.broadcast %cst : f32 to vector<8x512xf32>
      %21 = arith.mulf %20, %19 : vector<8x512xf32>
      %cst_10 = arith.constant 0.707106769 : f32
      %22 = vector.broadcast %cst_10 : f32 to vector<8x512xf32>
      %23 = arith.mulf %19, %22 : vector<8x512xf32>
      %24 = math.erf %23 : vector<8x512xf32>
      %cst_11 = arith.constant 1.000000e+00 : f32
      %25 = vector.broadcast %cst_11 : f32 to vector<8x512xf32>
      %26 = arith.addf %25, %24 : vector<8x512xf32>
      %27 = arith.mulf %21, %26 : vector<8x512xf32>
      %c0_12 = arith.constant 0 : index
      %c0_13 = arith.constant 0 : index
      %28 = vector.load %arg6[%c0_12, %c0_13] : memref<8x512xf32, #tpu.memory_space<vmem>>, vector<8x512xf32>
      tpu.vector_store %arg6[%c0_12, %c0_13], %27 {strides = array<i32>} : memref<8x512xf32, #tpu.memory_space<vmem>>, vector<8x512xf32>,
    } else {
    }
    return
  }
  func.func @transform_0(%arg0: i32, %arg1: i32) -> (i32, i32) {
    %c1_i32 = arith.constant 1 : i32
    %0 = arith.subi %c1_i32, %arg0 : i32
    %1 = arith.muli %arg1, %0 : i32
    %c0_i32 = arith.constant 0 : i32
    %c0_i32_0 = arith.constant 0 : i32
    return %c0_i32, %1 : i32, i32
  }
  func.func @transform_1(%arg0: i32, %arg1: i32) -> (i32, i32) {
    %c0_i32 = arith.constant 0 : i32
    %c0_i32_0 = arith.constant 0 : i32
    %c0_i32_1 = arith.constant 0 : i32
    return %c0_i32, %c0_i32_0 : i32, i32
  }
  func.func @transform_2(%arg0: i32, %arg1: i32) -> (i32, i32) {
    %c0_i32 = arith.constant 0 : i32
    %c0_i32_0 = arith.constant 0 : i32
    %c0_i32_1 = arith.constant 0 : i32
    return %c0_i32, %c0_i32_0 : i32, i32
  }
  func.func @transform_3(%arg0: i32, %arg1: i32) -> (i32, i32) {
    %c0_i32 = arith.constant 0 : i32
    %c0_i32_0 = arith.constant 0 : i32
    %c0_i32_1 = arith.constant 0 : i32
    return %c0_i32, %c0_i32_0 : i32, i32
  }
  func.func @transform_4(%arg0: i32, %arg1: i32) -> (i32, i32) {
    %0 = arith.muli %arg1, %arg0 : i32
    %c0_i32 = arith.constant 0 : i32
    %c0_i32_0 = arith.constant 0 : i32
    return %c0_i32, %0 : i32, i32
  }
}

</mosaic_0001>

<bundles_post_ra>
// kernel: conv_bn_gelu.1
= control target key start
LH: loop header
LB: loop body
LE: loop exit
PB: predicated region body
PF: predicated region fallthrough
CT: control target
= control target key end

     0   :  { %s737_s15 = smov 0   ;;  %s739_s16 = smov 0   ;;  %s825_s0 = inlined_call_operand.vmem [shape: bf16[36,512], index: 0, kind: input, shape index: {}]   ;;  %s826_s1 = inlined_call_operand.vmem [shape: bf16[8,36], index: 1, kind: input, shape index: {}]   ;;  %s827_s2 = inlined_call_operand.vmem [shape: f32[8,1], index: 2, kind: input, shape index: {}]   ;;  %s828_s3 = inlined_call_operand.vmem [shape: f32[8,1], index: 3, kind: input, shape index: {}]   ;;  %s829_s4 = inlined_call_operand.vmem [shape: f32[8,512], index: 4, kind: output, shape index: {}]  }
   0x1   :  { %s741_s17 = smov 0  }
   0x2 LB: > { %s26_s18 = sadd.s32 1, %s703_s16  ;;  %p605_p0 = scmp.ge.s32.totalorder %s707_s17, 1  ;;  %s707_s17 = sphi %s741_s17, %s14_s17   ;;  %s703_s16 = sphi %s739_s16, %s831_s16   ;;  %s699_s15 = sphi %s737_s15, %s830_s15  }
   0x3   : > { %p28_p1 = scmp.ge.s32.totalorder %s26_s18, 2  ;;  %p185_p2 = scmp.lt.s32.totalorder %s707_s17, 3 }
   0x5   : > { %s833_s18 = smov (%p28_p1, %s26_s18), 0  ;;  %p186_p3 = pnand %p605_p0, %p185_p2 }
   0x6   : > { %p606_p4 = scmp.ne.s32.totalorder (!%p186_p3), %s699_s15, 0 }
   0x7   : > { %189 = sbr.rel (%p186_p3) target bundleno = 875 (0x36b), region = 36 }
   0xe   : > { %236 = sbr.rel (%p606_p4) target bundleno = 684 (0x2ac), region = 40  ;;  %v658_v0 = vld [vmem:[%s825_s0 + $0x4] ss:$16 sps:$4 sm:$0xff] (!%p606_p4)   ;;  %v660_v1 = vld [vmem:[%s825_s0 + $0xc] ss:$16 sps:$4 sm:$0xff] (!%p606_p4)   ;;  %v709_v2 = vmov (!%p606_p4), 0  }
   0xf   : > { %347 = vmatprep.mubr.bf16.mxu0 (!%p606_p4), %v709_v2  ;;  %388 = vmatprep.mubr.bf16.mxu1 (!%p606_p4), %v709_v2  ;;  %v662_v3 = vld [vmem:[%s825_s0] ss:$16 sps:$4 sm:$0xff] (!%p606_p4)   ;;  %v663_v4 = vld [vmem:[%s825_s0 + $0x8] ss:$16 sps:$4 sm:$0xff] (!%p606_p4)   ;;  %v664_v5 = vld [vmem:[%s825_s0 + $0x24] ss:$16 sps:$4 sm:$0xff] (!%p606_p4)  }
  0x10   : > { %315 = vmatprep.subr.bf16.mxu0 (!%p606_p4), %v658_v0  ;;  %657 = vset.pattern.permute.xlu0 (!%p606_p4), %v709_v2  ;;  %v666_v6 = vld [vmem:[%s825_s0 + $0x2c] ss:$16 sps:$4 sm:$0xff] (!%p606_p4)   ;;  %v668_v7 = vld [vmem:[%s825_s0 + $0x20] ss:$16 sps:$4 sm:$0xff] (!%p606_p4)   ;;  %vm302_vm0 = vcmask (!%p606_p4), 1041408   ;;  %vm298_vm1 = vcmask (!%p606_p4), 293888  }
  0x11   : > { %356 = vmatprep.subr.bf16.mxu1 (!%p606_p4), %v660_v1  ;;  %316 = vmatpush1.bf16.msra.mxu0 (!%p606_p4), %v662_v3  ;;  %v669_v8 = vld [vmem:[%s825_s0 + $0x28] ss:$16 sps:$4 sm:$0xff] (!%p606_p4)   ;;  %v246_v9 = vld [vmem:[%s825_s0 + $0x40] sm:$0x33] (!%p606_p4)  ;;  %vm408_vm2 = vcmask (!%p606_p4), 7168   ;;  %v710_v32 = vmov (!%p606_p4), 0.0  }
  0x12   : > { %357 = vmatpush1.bf16.msra.mxu1 (!%p606_p4), %v663_v4  ;;  %317 = vmatprep.subr.bf16.mxu0 (!%p606_p4), %v664_v5  ;;  %v247_v10 = vld [vmem:[%s825_s0 + $0x48] sm:$0x33] (!%p606_p4)  ;;  %v616_v11 = vcombine.high (!%p606_p4), %v246_v9, %v246_v9  ;;  %v615_v13 = vcombine.low (!%p606_p4), %v246_v9, %v246_v9  ;;  %v237_v17 = vld [vmem:[%s826_s1] sm:$0xf] (!%p606_p4)  ;;  %409 = vst.msk [vmem:[#allocation3] sm:$0xff] (!%p606_p4), %vm408_vm2, %v710_v32  ;;  %410 = vst.msk [vmem:[#allocation4] sm:$0xff] (!%p606_p4), %vm408_vm2, %v710_v32 }
  0x13   : > { %358 = vmatprep.subr.bf16.mxu1 (!%p606_p4), %v666_v6  ;;  %v618_v12 = vcombine.high (!%p606_p4), %v247_v10, %v247_v10  ;;  %v617_v14 = vcombine.low (!%p606_p4), %v247_v10, %v247_v10 }
  0x14   : > { %v304_v15 = vsel (!%p606_p4), %vm302_vm0, %v615_v13, 0 }
  0x15   : > { %318 = vmatpush1.bf16.msra.mxu0 %v668_v7  ;;  %v310_v16 = vsel %vm302_vm0, %v617_v14, 0 }
  0x16   : > { %359 = vmatpush1.bf16.msra.mxu1 %v669_v8  ;;  %619 = vmatprep.subr.msk.bf16.mxu0 %vm302_vm0, %v616_v11 }
  0x17   : > { %621 = vmatprep.subr.msk.bf16.mxu1 %vm302_vm0, %v618_v12 }
  0x19   : > { %320 = vmatpush1.bf16.msra.mxu0 %v304_v15  ;;  %v428_v48 = vld [vmem:[#allocation3] sm:$0xff]  ;;  %v437_v51 = vld [vmem:[#allocation4] sm:$0xff] }
  0x1a   : > { %361 = vmatpush1.bf16.msra.mxu1 %v310_v16 }
  0x1c   : > { %620 = vmatmul.mubr.msk.bf16.vlgmr.msra.gmra.mrb[0].mxu0 %vm298_vm1, %v237_v17 }
  0x1d   : > { %622 = vmatmul.mubr.msk.bf16.vlgmr.msra.gmra.mrb[0].mxu1 %vm298_vm1, %v237_v17 }
  0xef   : > { %v349_v18 = vpop.f32.mrb[0].mxu0 }
  0xf0   : > { %v390_v19 = vpop.f32.mrb[0].mxu1  ;;  %400 = vst [vmem:[#allocation2] sm:$0xff] %v349_v18  ;;  %v351_v20 = vpop.f32.mrb[1].mxu0 }
  0xf1   : > { %402 = vst [vmem:[#allocation2 + $0x10] sm:$0xff] %v390_v19  ;;  %v392_v21 = vpop.f32.mrb[1].mxu1  ;;  %401 = vst [vmem:[#allocation2 + $0x8] sm:$0xff] %v351_v20  ;;  %v411_v22 = vadd.f32 %v351_v20, %v349_v18  ;;  %v353_v23 = vpop.f32.mrb[2].mxu0 }
  0xf2   : > { %403 = vst [vmem:[#allocation2 + $0x18] sm:$0xff] %v392_v21  ;;  %v394_v24 = vpop.f32.mrb[2].mxu1  ;;  %v354_v25 = vpop.f32.mrb[3].mxu0 }
  0xf3   : > { %v395_v26 = vpop.f32.mrb[3].mxu1  ;;  %v412_v27 = vadd.f32 %v411_v22, %v390_v19 }
  0xf5   : > { %v413_v28 = vadd.f32 %v412_v27, %v392_v21 }
  0xf7   : > { %414 = vadd.xlane.f32.xlu0 %v413_v28 }
 0x184   : > { %v415_v29 = vpop.xlane.xlu0 %414 }
 0x185   : > { %v416_v30 = vmul.f32 0.001953125, %v415_v29 }
 0x187   : > { %417 = vst.msk [vmem:[#allocation5] sm:$0xff] %vm408_vm2, %v416_v30 }
 0x18e   : > { %v418_v31 = vld [vmem:[#allocation5] sm:$0xff] }
 0x18f   : > { %421 = vperm.xlu0 %657, %v418_v31  }
 0x20e   : > { %v422_v33 = vpop.permute.xlu0 %421 }
 0x20f   : > { %v424_v34 = vsub.f32 %v349_v18, %v422_v33  ;;  %v425_v35 = vsub.f32 %v351_v20, %v422_v33  ;;  %v426_v36 = vsub.f32 %v390_v19, %v422_v33  ;;  %v427_v39 = vsub.f32 %v392_v21, %v422_v33 }
 0x211   : > { %v438_v37 = vmul.f32 %v424_v34, %v424_v34  ;;  %v439_v38 = vmul.f32 %v425_v35, %v425_v35  ;;  %v429_v40 = vadd.f32 %v425_v35, %v424_v34  ;;  %v440_v42 = vmul.f32 %v426_v36, %v426_v36 }
 0x212   : > { %v441_v45 = vmul.f32 %v427_v39, %v427_v39 }
 0x213   : > { %v430_v41 = vadd.f32 %v429_v40, %v426_v36  ;;  %v442_v43 = vadd.f32 %v439_v38, %v438_v37 }
 0x215   : > { %v431_v44 = vadd.f32 %v430_v41, %v427_v39  ;;  %v443_v46 = vadd.f32 %v442_v43, %v440_v42 }
 0x217   : > { %432 = vadd.xlane.f32.xlu1 %v431_v44  ;;  %v444_v47 = vadd.f32 %v443_v46, %v441_v45 }
 0x21b   : > { %445 = vadd.xlane.f32.xlu1 %v444_v47 }
 0x2a4   : > { %v433_v49 = vpop.xlane.xlu1 %432 }
 0x2a5   : > { %v434_v50 = vadd.f32 %v433_v49, %v428_v48 }
 0x2a7   : > { %436 = vst.msk [vmem:[#allocation3] sm:$0xff] %vm408_vm2, %v434_v50 }
 0x2a8   : > { %v446_v52 = vpop.xlane.xlu1 %445 }
 0x2a9   : > { %v447_v53 = vadd.f32 %v446_v52, %v437_v51 }
 0x2ab   : > { %448 = vst.msk [vmem:[#allocation4] sm:$0xff] %vm408_vm2, %v447_v53 }
 0x2ac PF: > { %p449_p5 = scmp.eq.s32.totalorder %s699_s15, 1 }
 0x2ad   : > { %v457_v62 = vld [vmem:[#allocation5] sm:$0xff] (%p449_p5)  ;;  %v464_v63 = vld [vmem:[%s827_s2] sm:$0xff] (%p449_p5)  ;;  %vm468_vm3 = vcmask (%p449_p5), 7168  }
 0x2ae   : > { %454 = sbr.rel (!%p449_p5) target bundleno = 717 (0x2cd), region = 48  ;;  %v470_v3 = vld [vmem:[%s828_s3] sm:$0xff] (%p449_p5) }
 0x2b0   : > { %v455_v54 = vld [vmem:[#allocation3] sm:$0xff] (%p449_p5) }
 0x2b1   : > { %v456_v56 = vmul.f32 (%p449_p5), 0.001953125, %v455_v54 }
 0x2b2   : > { %v459_v55 = vld [vmem:[#allocation4] sm:$0xff] (%p449_p5) }
 0x2b3   : > { %v460_v57 = vmul.f32 (%p449_p5), 0.001953125, %v459_v55  ;;  %v461_v58 = vmul.f32 (%p449_p5), %v456_v56, %v456_v56  ;;  %v458_v0 = vadd.f32 (%p449_p5), %v457_v62, %v456_v56 }
 0x2b5   : > { %v462_v59 = vsub.f32 %v460_v57, %v461_v58 }
 0x2b7   : > { %v463_v60 = vmax.f32 %v462_v59, 0.0 }
 0x2b9   : > { %v465_v61 = vadd.f32 1e-05, %v463_v60 }
 0x2bb   : > { %674 = vrsqrt.f32 %v465_v61 }
 0x2c5   : > { %v675_v1 = vpop.eup %674 }
 0x2c6   : > { %v467_v2 = vmul.f32 %v675_v1, %v464_v63 }
 0x2c8   : > { %469 = vst.msk [vmem:[#allocation6] sm:$0xff] %vm468_vm3, %v467_v2  ;;  %v471_v4 = vmul.f32 %v467_v2, %v458_v0 }
 0x2ca   : > { %v472_v5 = vsub.f32 %v470_v3, %v471_v4 }
 0x2cc   : > { %473 = vst.msk [vmem:[#allocation7] sm:$0xff] %vm468_vm3, %v472_v5 }
 0x2cd PF: > { %p624_p6 = scmp.ne.s32.totalorder %s699_s15, 1 }
 0x2ce   : > { %v711_v7 = vmov (!%p624_p6), 0   ;;  %v480_v9 = vld [vmem:[#allocation2] sm:$0xff] (!%p624_p6)  ;;  %v481_v11 = vld [vmem:[#allocation2 + $0x8] sm:$0xff] (!%p624_p6)  ;;  %v482_v12 = vld [vmem:[#allocation2 + $0x10] sm:$0xff] (!%p624_p6) }
 0x2cf   : > { %476 = sbr.rel (%p624_p6) target bundleno = 875 (0x36b), region = 52  ;;  %v484_v6 = vld [vmem:[#allocation6] sm:$0xff] (!%p624_p6)  ;;  %676 = vset.pattern.permute.xlu0 (!%p624_p6), %v711_v7 }
 0x2d0   : > { %487 = vperm.xlu0 (!%p624_p6), %676, %v484_v6   ;;  %v483_v13 = vld [vmem:[#allocation2 + $0x18] sm:$0xff] (!%p624_p6) }
 0x2d3   : > { %v494_v8 = vld [vmem:[#allocation7] sm:$0xff] (!%p624_p6) }
 0x2d4   : > { %497 = vperm.xlu0 (!%p624_p6), %676, %v494_v8  }
 0x34f   : > { %v488_v10 = vpop.permute.xlu0 %487 }
 0x350   : > { %v490_v14 = vmul.f32 %v488_v10, %v480_v9  ;;  %v491_v15 = vmul.f32 %v488_v10, %v481_v11  ;;  %v492_v16 = vmul.f32 %v488_v10, %v482_v12  ;;  %v493_v17 = vmul.f32 %v488_v10, %v483_v13 }
 0x353   : > { %v498_v18 = vpop.permute.xlu0 %497 }
 0x354   : > { %v500_v19 = vadd.f32 %v498_v18, %v490_v14  ;;  %v501_v20 = vadd.f32 %v498_v18, %v491_v15  ;;  %v502_v21 = vadd.f32 %v498_v18, %v492_v16  ;;  %v503_v22 = vadd.f32 %v498_v18, %v493_v17 }
 0x356   : > { %v508_v23 = vmul.f32 0.70710677, %v500_v19  ;;  %v509_v24 = vmul.f32 0.70710677, %v501_v20  ;;  %v510_v25 = vmul.f32 0.70710677, %v502_v21 }
 0x357   : > { %v511_v26 = vmul.f32 0.70710677, %v503_v22  ;;  %v504_v29 = vmul.f32 0.5, %v500_v19  ;;  %v505_v32 = vmul.f32 0.5, %v501_v20  ;;  %v506_v35 = vmul.f32 0.5, %v502_v21 }
 0x358   : > { %677 = verf.f32 %v508_v23  ;;  %v507_v38 = vmul.f32 0.5, %v503_v22 }
 0x359   : > { %679 = verf.f32 %v509_v24 }
 0x35a   : > { %681 = verf.f32 %v510_v25 }
 0x35b   : > { %683 = verf.f32 %v511_v26 }
 0x362   : > { %v678_v27 = vpop.eup %677 }
 0x363   : > { %v680_v28 = vpop.eup %679  ;;  %v516_v30 = vadd.f32 1.0, %v678_v27 }
 0x364   : > { %v682_v31 = vpop.eup %681  ;;  %v517_v33 = vadd.f32 1.0, %v680_v28 }
 0x365   : > { %v684_v34 = vpop.eup %683  ;;  %v518_v36 = vadd.f32 1.0, %v682_v31  ;;  %v520_v37 = vmul.f32 %v516_v30, %v504_v29 }
 0x366   : > { %v519_v39 = vadd.f32 1.0, %v684_v34  ;;  %v521_v40 = vmul.f32 %v517_v33, %v505_v32 }
 0x367   : > { %v522_v41 = vmul.f32 %v518_v36, %v506_v35  ;;  %524 = vst [vmem:[%s829_s4] sm:$0xff] %v520_v37 }
 0x368   : > { %v523_v42 = vmul.f32 %v519_v39, %v507_v38  ;;  %525 = vst [vmem:[%s829_s4 + $0x8] sm:$0xff] %v521_v40 }
 0x369   : > { %526 = vst [vmem:[%s829_s4 + $0x10] sm:$0xff] %v522_v41 }
 0x36a   : > { %527 = vst [vmem:[%s829_s4 + $0x18] sm:$0xff] %v523_v42 }
 0x36b PF: > { %s14_s17 = sadd.s32 1, %s707_s17   ;;  %s830_s15 = smov %s703_s16 }
 0x36c   : > { %p11_p7 = scmp.ge.s32.totalorder %s14_s17, 4   ;;  %s831_s16 = smov %s833_s18 }
 0x36e   :  { %13 = sbr.rel (!%p11_p7) target bundleno = 2 (0x2), region = 84 }

</bundles_post_ra>
